<compile_context>
chip_gen: v7x
topology: tpu7x:2x2x1
jax: 0.10.0
libtpu: 0.0.40
codegen_flags: <defaults>
</compile_context>

<pallas_src>
import functools

import jax
import jax.numpy as jnp
from jax.experimental import pallas as pl
from jax.experimental.pallas import tpu as pltpu


def _round_up(x, m):
    return (x + m - 1) // m * m


def _cdiv(a, b):
    return (a + b - 1) // b


# ---------------------------------------------------------------------------
# Hardware-aware VMEM budget (physical capacity minus headroom for Mosaic
# internal scratch).  v5e/v6e: ~116 MiB, v7x: ~52 MiB.
# ---------------------------------------------------------------------------
@functools.lru_cache(maxsize=1)
def _vmem_budget_bytes():
    try:
        cap = int(pltpu.get_tpu_info().vmem_capacity_bytes)
    except Exception:
        cap = 64 << 20  # conservative default if the query is unavailable
    return max(16 << 20, cap - (12 << 20))


# ---------------------------------------------------------------------------
# Probe pl.Buffered(1) support once on a tiny kernel, so failures in the real
# kernel are never silently swallowed.
# ---------------------------------------------------------------------------
@functools.lru_cache(maxsize=1)
def _buffered_1_supported():
    def _copy_kernel(a_ref, o_ref):
        o_ref[...] = a_ref[...]

    try:
        x = jnp.zeros((8, 128), jnp.float32)
        out = pl.pallas_call(
            _copy_kernel,
            out_shape=jax.ShapeDtypeStruct((8, 128), jnp.float32),
            grid=(1,),
            in_specs=[pl.BlockSpec((8, 128), lambda i: (0, 0),
                                   pipeline_mode=pl.Buffered(1))],
            out_specs=pl.BlockSpec((8, 128), lambda i: (0, 0)),
        )(x)
        jax.block_until_ready(out)
        return True
    except Exception:
        return False


# ---------------------------------------------------------------------------
# Path A: whole [d_model, vocab] weight resident in VMEM -> single fused
# matmul + log-softmax kernel.
# ---------------------------------------------------------------------------
def _generator_kernel(x_ref, w_ref, b_ref, o_ref):
    # x_ref: (TM, d_model) bf16   w_ref: (d_model, vocab) bf16 (resident)
    # b_ref: (1, vocab) f32       o_ref: (TM, vocab)
    logits = jnp.dot(x_ref[...], w_ref[...], preferred_element_type=jnp.float32)
    logits = logits + b_ref[...]

    m = jnp.max(logits, axis=-1, keepdims=True)
    shifted = logits - m
    lse = jnp.log(jnp.sum(jnp.exp(shifted), axis=-1, keepdims=True))
    o_ref[...] = (shifted - lse).astype(o_ref.dtype)


def _resident_generator(x2d, w_t, b_row, *, tm, out_dtype, vmem_limit,
                        single_buffer_weight):
    n_pad, d_model = x2d.shape
    vocab = w_t.shape[1]

    if single_buffer_weight:
        # Constant index_map => nothing to prefetch; single-buffer the weight.
        w_spec = pl.BlockSpec((d_model, vocab), lambda i: (0, 0),
                              pipeline_mode=pl.Buffered(1))
        b_spec = pl.BlockSpec((1, vocab), lambda i: (0, 0),
                              pipeline_mode=pl.Buffered(1))
    else:
        w_spec = pl.BlockSpec((d_model, vocab), lambda i: (0, 0))
        b_spec = pl.BlockSpec((1, vocab), lambda i: (0, 0))

    return pl.pallas_call(
        _generator_kernel,
        out_shape=jax.ShapeDtypeStruct((n_pad, vocab), out_dtype),
        grid_spec=pltpu.PrefetchScalarGridSpec(
            num_scalar_prefetch=0,
            grid=(n_pad // tm,),
            in_specs=[
                pl.BlockSpec((tm, d_model), lambda i: (i, 0)),
                w_spec,
                b_spec,
            ],
            out_specs=pl.BlockSpec((tm, vocab), lambda i: (i, 0)),
        ),
        compiler_params=pltpu.CompilerParams(
            dimension_semantics=("parallel",),
            vmem_limit_bytes=vmem_limit,
        ),
    )(x2d, w_t, b_row)


# ---------------------------------------------------------------------------
# Path B: large vocab -> vocab-tiled, single fused kernel.  The per-row-tile
# logits slab stays resident in VMEM across the vocab ("arbitrary") axis; the
# online logsumexp runs in scratch and is subtracted in place at the last
# vocab tile.  No HBM round trip of raw logits, no second pallas_call.
# ---------------------------------------------------------------------------
def _tiled_kernel(x_ref, w_ref, b_ref, o_ref, m_sc, l_sc):
    j = pl.program_id(1)
    nj = pl.num_programs(1)
    tn = w_ref.shape[1]

    @pl.when(j == 0)
    def _():
        m_sc[...] = jnp.full_like(m_sc, -jnp.inf)
        l_sc[...] = jnp.zeros_like(l_sc)

    logits = jnp.dot(x_ref[...], w_ref[...], preferred_element_type=jnp.float32)
    logits = logits + b_ref[...]

    # Write this vocab tile's raw logits into the VMEM-resident output slab.
    col0 = pl.multiple_of(j * tn, 128)
    o_ref[:, pl.ds(col0, tn)] = logits.astype(o_ref.dtype)

    # Online max / running sum(exp) per row.
    m_prev = m_sc[...]
    m_new = jnp.maximum(m_prev, jnp.max(logits, axis=-1, keepdims=True))
    l_sc[...] = (l_sc[...] * jnp.exp(m_prev - m_new)
                 + jnp.sum(jnp.exp(logits - m_new), axis=-1, keepdims=True))
    m_sc[...] = m_new

    @pl.when(j == nj - 1)
    def _():
        lse = m_sc[...] + jnp.log(l_sc[...])

        # Subtract tile-by-tile so in-kernel temporaries stay tile-sized.
        def body(t, carry):
            c0 = pl.multiple_of(t * tn, 128)
            blk = o_ref[:, pl.ds(c0, tn)].astype(jnp.float32)
            o_ref[:, pl.ds(c0, tn)] = (blk - lse).astype(o_ref.dtype)
            return carry

        jax.lax.fori_loop(0, nj, body, 0)


def _tiled_generator(x2d, w_t, b_row, *, tm, tn, out_dtype, vmem_limit):
    n_pad, d_model = x2d.shape
    vocab_pad = w_t.shape[1]
    row_tiles = n_pad // tm
    vocab_tiles = vocab_pad // tn

    return pl.pallas_call(
        _tiled_kernel,
        out_shape=jax.ShapeDtypeStruct((n_pad, vocab_pad), out_dtype),
        grid_spec=pltpu.PrefetchScalarGridSpec(
            num_scalar_prefetch=0,
            grid=(row_tiles, vocab_tiles),
            in_specs=[
                pl.BlockSpec((tm, d_model), lambda i, j: (i, 0)),
                pl.BlockSpec((d_model, tn), lambda i, j: (0, j)),
                pl.BlockSpec((1, tn), lambda i, j: (0, j)),
            ],
            # Constant block index across j => output slab stays VMEM-resident
            # across the whole vocab axis for the current row tile.
            out_specs=pl.BlockSpec((tm, vocab_pad), lambda i, j: (i, 0)),
            scratch_shapes=[
                pltpu.VMEM((tm, 1), jnp.float32),   # running max
                pltpu.VMEM((tm, 1), jnp.float32),   # running sum(exp)
            ],
        ),
        compiler_params=pltpu.CompilerParams(
            dimension_semantics=("parallel", "arbitrary"),
            vmem_limit_bytes=vmem_limit,
        ),
    )(x2d, w_t, b_row)


# ---------------------------------------------------------------------------
# Public wrapper
# ---------------------------------------------------------------------------
def generator_forward(x, weight, bias, *, tm=256, tn=2048,
                      out_dtype=jnp.float32, force_vocab_tiling=False):
    """x: [..., d_model]; weight: [vocab, d_model] (PyTorch layout); bias: [vocab]."""
    d_model = x.shape[-1]
    vocab = weight.shape[0]
    lead_shape = x.shape[:-1]

    x2d = x.reshape(-1, d_model)
    n = x2d.shape[0]

    # bf16 MXU operands, f32 accumulation & softmax math.
    x_bf = x2d.astype(jnp.bfloat16)
    w_t = weight.T.astype(jnp.bfloat16)                  # [d_model, vocab]
    b_row = bias.astype(jnp.float32).reshape(1, vocab)   # pre-cast once (hoisted)

    out_isz = jnp.dtype(out_dtype).itemsize
    budget = _vmem_budget_bytes()
    single_w = _buffered_1_supported()

    # ----- Path A feasibility: weight counted once when single-buffered,
    #       x/out double-buffers and ~2x f32 in-kernel temporaries included.
    w_copies = 1 if single_w else 2
    fixed_a = w_copies * (d_model * vocab * 2 + vocab * 4)
    per_row_a = (4 * d_model            # x double-buffer, bf16
                 + 2 * vocab * out_isz  # out double-buffer
                 + 8 * vocab)           # f32 logits / exp temporaries
    tm_fit_a = (budget - fixed_a) // per_row_a if budget > fixed_a else 0
    tm_fit_a = int(tm_fit_a) // 8 * 8

    use_tiling = force_vocab_tiling or tm_fit_a < 8

    if not use_tiling:
        # Shrink tm (cheap: ~0.35us per extra grid step) rather than giving up
        # the resident-weight fused path.
        tm_eff = min(tm, tm_fit_a)
        if n >= 64:
            # Ensure >=2 row tiles so both v7x TensorCores get work.
            tm_eff = min(tm_eff, _round_up(_cdiv(n, 2), 16))
        tm_eff = max(8, min(tm_eff, _round_up(n, 8)))
        tm_eff = max(8, (tm_eff // 8) * 8)

        n_pad = _round_up(n, tm_eff)
        if n_pad != n:
            x_bf = jnp.pad(x_bf, ((0, n_pad - n), (0, 0)))

        out = _resident_generator(x_bf, w_t, b_row, tm=tm_eff,
                                  out_dtype=out_dtype, vmem_limit=int(budget),
                                  single_buffer_weight=single_w)
        out = out[:n]
    else:
        # ----- Path B tile selection: big tm (reduces weight re-streaming per
        # row tile), tn shrunk if needed so the resident logits slab fits.
        tn_eff = _round_up(min(max(tn, 128), _round_up(vocab, 128)), 128)
        tm_b_cap = max(tm, 512)
        while True:
            vocab_pad = _round_up(vocab, tn_eff)
            fixed_b = 4 * d_model * tn_eff + 8 * tn_eff      # W / bias tiles (x2)
            per_row_b = (2 * vocab_pad * out_isz             # resident logits slab (x2 across i)
                         + 4 * d_model                       # x double-buffer, bf16
                         + 8 * tn_eff                        # f32 tile temporaries
                         + 32)                               # m/l scratch
            tm_fit_b = (budget - fixed_b) // per_row_b if budget > fixed_b else 0
            tm_fit_b = int(tm_fit_b) // 8 * 8
            if tm_fit_b >= 8 or tn_eff <= 128:
                break
            tn_eff = max(128, tn_eff // 2)

        if tm_fit_b < 8:
            # TODO(synk): vocab so large that even an 8-row logits slab does
            # not fit in VMEM would need an HBM logits round trip / bf16 slab;
            # use best-effort minimal tiles here.
            tm_fit_b = 8

        tm_eff = min(tm_b_cap, tm_fit_b)
        if n >= 64:
            tm_eff = min(tm_eff, _round_up(_cdiv(n, 2), 16))
        tm_eff = max(8, min(tm_eff, _round_up(n, 8)))
        tm_eff = max(8, (tm_eff // 8) * 8)

        n_pad = _round_up(n, tm_eff)
        if n_pad != n:
            x_bf = jnp.pad(x_bf, ((0, n_pad - n), (0, 0)))

        vocab_pad = _round_up(vocab, tn_eff)
        if vocab_pad != vocab:
            # Zero weight columns + very negative bias so padded vocab entries
            # underflow to 0 in the normalizer.
            w_t = jnp.pad(w_t, ((0, 0), (0, vocab_pad - vocab)))
            b_row = jnp.pad(b_row, ((0, 0), (0, vocab_pad - vocab)),
                            constant_values=-1e30)

        out = _tiled_generator(x_bf, w_t, b_row, tm=tm_eff, tn=tn_eff,
                               out_dtype=out_dtype, vmem_limit=int(budget))
        out = out[:n, :vocab]

    return out.reshape(*lead_shape, vocab)


if __name__ == "__main__":
    # Small shapes consistent with the module: batch=2, seq=8, d_model=32, vocab=128
    batch, seq, d_model, vocab = 2, 8, 32, 128

    key = jax.random.PRNGKey(0)
    kx, kw, kb = jax.random.split(key, 3)

    x = jax.random.normal(kx, (batch, seq, d_model), dtype=jnp.float32)
    # Deterministic parameter init mimicking nn.Linear's uniform(-1/sqrt(d), 1/sqrt(d))
    bound = 1.0 / (d_model ** 0.5)
    weight = jax.random.uniform(kw, (vocab, d_model), jnp.float32, -bound, bound)
    bias = jax.random.uniform(kb, (vocab,), jnp.float32, -bound, bound)

    y = generator_forward(x, weight, bias)
    jax.block_until_ready(y)
    assert y.shape == (batch, seq, vocab)

    # Reference matching the kernel's bf16-operand / f32-accumulate matmul.
    def ref_fn(x_, w_, b_):
        logits = (x_.astype(jnp.bfloat16).astype(jnp.float32)
                  @ w_.astype(jnp.bfloat16).astype(jnp.float32).T
                  + b_.astype(jnp.float32))
        return jax.nn.log_softmax(logits, axis=-1)

    assert jnp.allclose(y, ref_fn(x, weight, bias), atol=1e-3, rtol=1e-3)

    # Semantic check against the full-f32 PyTorch-equivalent forward
    # (looser tolerance because matmul operands are bf16).
    ref_f32 = jax.nn.log_softmax(x @ weight.T + bias, axis=-1)
    assert jnp.allclose(y, ref_f32, atol=5e-2, rtol=5e-2)

    # Also exercise the vocab-tiled (large-vocab) path on small shapes,
    # including a non-multiple-of-128 vocab to test column padding.
    vocab2 = 200
    kw2, kb2 = jax.random.split(kb)
    w2 = jax.random.uniform(kw2, (vocab2, d_model), jnp.float32, -bound, bound)
    b2 = jax.random.uniform(kb2, (vocab2,), jnp.float32, -bound, bound)
    y2 = generator_forward(x, w2, b2, tn=128, force_vocab_tiling=True)
    jax.block_until_ready(y2)
    assert y2.shape == (batch, seq, vocab2)
    assert jnp.allclose(y2, ref_fn(x, w2, b2), atol=1e-3, rtol=1e-3)

    print("KERNEL_OK")
</pallas_src>

<mosaic_0001>
module attributes {stable_mosaic.version = 11 : i64} {
  func.func @_copy_kernel(%arg0: i32, %arg1: memref<8x128xf32, #tpu.memory_space<vmem>>, %arg2: memref<8x128xf32, #tpu.memory_space<vmem>>) attributes {dimension_semantics = [#tpu.dimension_semantics<arbitrary>], iteration_bounds = array<i64: 1>, scalar_prefetch = 0 : i64, scratch_operands = 0 : i64, tpu.core_type = #tpu.core_type<tc>, window_params = [{pipeline_mode = #tpu.pipeline_mode<synchronous>, transform_indices = @transform_0, window_bounds = array<i64: 8, 128>}, {pipeline_mode = #tpu.pipeline_mode<synchronous>, transform_indices = @transform_1, window_bounds = array<i64: 8, 128>}]} {
    %c0 = arith.constant 0 : index
    %c0_0 = arith.constant 0 : index
    %0 = vector.load %arg1[%c0, %c0_0] : memref<8x128xf32, #tpu.memory_space<vmem>>, vector<8x128xf32>
    %c0_1 = arith.constant 0 : index
    %c0_2 = arith.constant 0 : index
    %1 = vector.load %arg2[%c0_1, %c0_2] : memref<8x128xf32, #tpu.memory_space<vmem>>, vector<8x128xf32>
    tpu.vector_store %arg2[%c0_1, %c0_2], %0 {strides = array<i32>} : memref<8x128xf32, #tpu.memory_space<vmem>>, vector<8x128xf32>,
    return
  }
  func.func @transform_0(%arg0: i32) -> (i32, i32) {
    %c0_i32 = arith.constant 0 : i32
    %c0_i32_0 = arith.constant 0 : i32
    %c0_i32_1 = arith.constant 0 : i32
    return %c0_i32, %c0_i32_0 : i32, i32
  }
  func.func @transform_1(%arg0: i32) -> (i32, i32) {
    %c0_i32 = arith.constant 0 : i32
    %c0_i32_0 = arith.constant 0 : i32
    %c0_i32_1 = arith.constant 0 : i32
    return %c0_i32, %c0_i32_0 : i32, i32
  }
}

module attributes {stable_mosaic.version = 11 : i64} {
  func.func @_generator_kernel(%arg0: i32, %arg1: memref<16x32xbf16, #tpu.memory_space<vmem>>, %arg2: memref<32x128xbf16, #tpu.memory_space<vmem>>, %arg3: memref<1x128xf32, #tpu.memory_space<vmem>>, %arg4: memref<16x128xf32, #tpu.memory_space<vmem>>) attributes {dimension_semantics = [#tpu.dimension_semantics<parallel>], iteration_bounds = array<i64: 1>, scalar_prefetch = 0 : i64, scratch_operands = 0 : i64, tpu.core_type = #tpu.core_type<tc>, window_params = [{transform_indices = @transform_0, window_bounds = array<i64: 16, 32>}, {pipeline_mode = #tpu.pipeline_mode<synchronous>, transform_indices = @transform_1, window_bounds = array<i64: 32, 128>}, {pipeline_mode = #tpu.pipeline_mode<synchronous>, transform_indices = @transform_2, window_bounds = array<i64: 1, 128>}, {transform_indices = @transform_3, window_bounds = array<i64: 16, 128>}]} {
    %c0 = arith.constant 0 : index
    %c0_0 = arith.constant 0 : index
    %0 = vector.load %arg1[%c0, %c0_0] : memref<16x32xbf16, #tpu.memory_space<vmem>>, vector<16x32xbf16>
    %c0_1 = arith.constant 0 : index
    %c0_2 = arith.constant 0 : index
    %1 = vector.load %arg2[%c0_1, %c0_2] : memref<32x128xbf16, #tpu.memory_space<vmem>>, vector<32x128xbf16>
    %cst = arith.constant dense<0.000000e+00> : vector<16x128xf32>
    %2 = tpu.matmul %0, %1, %cst {dimension_numbers = #tpu.dot_dimension_numbers<[1], [0], [0], [1], [0, 0, 1, 1], [], []>} : vector<16x32xbf16>, vector<32x128xbf16>, vector<16x128xf32> -> vector<16x128xf32>
    %c0_3 = arith.constant 0 : index
    %c0_4 = arith.constant 0 : index
    %3 = vector.load %arg3[%c0_3, %c0_4] : memref<1x128xf32, #tpu.memory_space<vmem>>, vector<1x128xf32>
    %4 = vector.broadcast %3 : vector<1x128xf32> to vector<16x128xf32>
    %5 = arith.addf %2, %4 : vector<16x128xf32>
    %cst_5 = arith.constant dense<0xFF800000> : vector<16xf32>
    %6 = vector.multi_reduction <maximumf>, %5, %cst_5 [1] : vector<16x128xf32> to vector<16xf32>
    %7 = vector.shape_cast %6 : vector<16xf32> to vector<16x1xf32>
    %8 = vector.broadcast %7 : vector<16x1xf32> to vector<16x128xf32>
    %9 = arith.subf %5, %8 : vector<16x128xf32>
    %10 = math.exp %9 : vector<16x128xf32>
    %cst_6 = arith.constant dense<0.000000e+00> : vector<16xf32>
    %11 = vector.multi_reduction <add>, %10, %cst_6 [1] : vector<16x128xf32> to vector<16xf32>
    %12 = vector.shape_cast %11 : vector<16xf32> to vector<16x1xf32>
    %13 = math.log %12 : vector<16x1xf32>
    %14 = vector.broadcast %13 : vector<16x1xf32> to vector<16x128xf32>
    %15 = arith.subf %9, %14 : vector<16x128xf32>
    %c0_7 = arith.constant 0 : index
    %c0_8 = arith.constant 0 : index
    %16 = vector.load %arg4[%c0_7, %c0_8] : memref<16x128xf32, #tpu.memory_space<vmem>>, vector<16x128xf32>
    tpu.vector_store %arg4[%c0_7, %c0_8], %15 {strides = array<i32>} : memref<16x128xf32, #tpu.memory_space<vmem>>, vector<16x128xf32>,
    return
  }
  func.func @transform_0(%arg0: i32) -> (i32, i32) {
    %c0_i32 = arith.constant 0 : i32
    %c0_i32_0 = arith.constant 0 : i32
    return %arg0, %c0_i32 : i32, i32
  }
  func.func @transform_1(%arg0: i32) -> (i32, i32) {
    %c0_i32 = arith.constant 0 : i32
    %c0_i32_0 = arith.constant 0 : i32
    %c0_i32_1 = arith.constant 0 : i32
    return %c0_i32, %c0_i32_0 : i32, i32
  }
  func.func @transform_2(%arg0: i32) -> (i32, i32) {
    %c0_i32 = arith.constant 0 : i32
    %c0_i32_0 = arith.constant 0 : i32
    %c0_i32_1 = arith.constant 0 : i32
    return %c0_i32, %c0_i32_0 : i32, i32
  }
  func.func @transform_3(%arg0: i32) -> (i32, i32) {
    %c0_i32 = arith.constant 0 : i32
    %c0_i32_0 = arith.constant 0 : i32
    return %arg0, %c0_i32 : i32, i32
  }
}

</mosaic_0001>

<bundles_post_ra>
// kernel: tpu_custom_call.1
= control target key start
LH: loop header
LB: loop body
LE: loop exit
PB: predicated region body
PF: predicated region fallthrough
CT: control target
= control target key end

     0   :  { %6 = vsyncpa [#allocation3], 0  ;;  %s124_s0 = inlined_call_operand.hbm [shape: f32[8,128], index: 0, kind: input, shape index: {}]   ;;  %s125_s1 = inlined_call_operand.hbm [shape: f32[8,128], index: 1, kind: output, shape index: {}]  }
   0x1   :  { %7 = vsyncpa [#allocation4], 0  ;;  %s88_s6 = smov [#allocation2]   ;;  %s40_s10 = scalar_lea.hbm %s124_s0, 128 }
   0x2   :  { %s14_s7 = sshll.u32 %s88_s6, 4  ;;  %p41_p0 = scmp.ne.s32.totalorder %s124_s0, %s40_s10  ;;  %s15_s7 = int_to_ptr.vmem [resolvable:$true] %s14_s7 }
   0x3   :  { %p44_p1 = scmp.lt.u32.totalorder %s40_s10, %s124_s0 }
   0x5   :  { %p46_p2 = pnand %p44_p1, %p41_p0 }
   0x7   :  { %49 = shalt.err (!%p46_p2)
}
   0x8   :  { %s50_s15 = scalar_lea.vmem %s15_s7, 128  ;;  %p55_p4 = scmp.lt.s32.totalorder %s15_s7, %s15_s7 }
   0x9   :  { %p51_p3 = scmp.ne.s32.totalorder %s15_s7, %s50_s15  ;;  %p56_p5 = scmp.lt.s32.totalorder %s50_s15, %s50_s15 }
   0xb   :  { %p57_p6 = por %p56_p5, %p55_p4 }
   0xd   :  { %p58_p7 = pnand %p57_p6, %p51_p3 }
   0xf   :  { %61 = shalt.err (!%p58_p7)
}
  0x10   :  { %17 = dma.hbm_to_vmem [thread:$0]  %s124_s0, 128, %s15_s7, [#allocation3]  }
  0x11   :  { %84 = dma.done.wait [#allocation3], 128  }
  0x12   :  { %85 = vsyncadd [#allocation3], 4294967168  ;;  %s89_s18 = smov [#allocation5]   ;;  %v21_v0 = vld [vmem:[#allocation2] sm:$0xff] }
  0x13   :  { %s29_s19 = sshll.u32 %s89_s18, 4  ;;  %22 = vst [vmem:[#allocation5] sm:$0xff] %v21_v0  ;;  %s30_s19 = int_to_ptr.vmem [resolvable:$true] %s29_s19 }
  0x14   :  { %s62_s20 = scalar_lea.vmem %s30_s19, 128  ;;  %p67_p9 = scmp.lt.s32.totalorder %s30_s19, %s30_s19 }
  0x15   :  { %p63_p8 = scmp.ne.s32.totalorder %s30_s19, %s62_s20  ;;  %p68_p10 = scmp.lt.s32.totalorder %s62_s20, %s62_s20 }
  0x17   :  { %p69_p11 = por %p68_p10, %p67_p9 }
  0x19   :  { %p70_p12 = pnand %p69_p11, %p63_p8 }
  0x1b   :  { %73 = shalt.err (!%p70_p12)
}
  0x1c   :  { %s74_s23 = scalar_lea.hbm %s125_s1, 128 }
  0x1d   :  { %p75_p13 = scmp.ne.s32.totalorder %s125_s1, %s74_s23  ;;  %p78_p0 = scmp.lt.u32.totalorder %s74_s23, %s125_s1 }
  0x1f   :  { %p80_p1 = pnand %p78_p0, %p75_p13 }
  0x21   :  { %83 = shalt.err (!%p80_p1)
}
  0x22   :  { %32 = dma.vmem_to_hbm [thread:$0]  %s30_s19, 128, %s125_s1, [#allocation4]  }
  0x23   :  { %86 = dma.done.wait [#allocation4], 128  }
  0x24   :  { %87 = vsyncadd [#allocation4], 4294967168 }
  0x25   :  { %36 = vsyncpa [#allocation3], 1 }
  0x26   :  { %37 = vsyncpa [#allocation4], 1 }

// kernel: tpu_custom_call.1
= control target key start
LH: loop header
LB: loop body
LE: loop exit
PB: predicated region body
PF: predicated region fallthrough
CT: control target
= control target key end

     0   :  { %8 = vsyncpa [#allocation3], 0  ;;  %s335_s0 = inlined_call_operand.hbm [shape: bf16[16,32], index: 0, kind: input, shape index: {}]   ;;  %s336_s1 = inlined_call_operand.hbm [shape: bf16[32,128], index: 1, kind: input, shape index: {}]   ;;  %s337_s2 = inlined_call_operand.vmem [shape: f32[1,128], index: 2, kind: input, shape index: {}]   ;;  %s338_s3 = inlined_call_operand.hbm [shape: f32[16,128], index: 3, kind: output, shape index: {}]  }
   0x1   :  { %9 = vsyncpa [#allocation6], 0 }
   0x2   :  { %10 = vsyncpa [#allocation4], 0  ;;  %s267_s12 = smov [#allocation2]   ;;  %s195_s16 = scalar_lea.hbm %s335_s0, 128 }
   0x3   :  { %s16_s13 = sshll.u32 %s267_s12, 4  ;;  %p196_p0 = scmp.ne.s32.totalorder %s335_s0, %s195_s16  ;;  %s17_s13 = int_to_ptr.vmem [resolvable:$true] %s16_s13 }
   0x4   :  { %p199_p1 = scmp.lt.u32.totalorder %s195_s16, %s335_s0 }
   0x6   :  { %p201_p2 = pnand %p199_p1, %p196_p0 }
   0x8   :  { %204 = shalt.err (!%p201_p2)
}
   0x9   :  { %s205_s21 = scalar_lea.vmem %s17_s13, 128  ;;  %p210_p4 = scmp.lt.s32.totalorder %s17_s13, %s17_s13 }
   0xa   :  { %p206_p3 = scmp.ne.s32.totalorder %s17_s13, %s205_s21  ;;  %p211_p5 = scmp.lt.s32.totalorder %s205_s21, %s205_s21 }
   0xc   :  { %p212_p6 = por %p211_p5, %p210_p4 }
   0xe   :  { %p213_p7 = pnand %p212_p6, %p206_p3 }
  0x10   :  { %216 = shalt.err (!%p213_p7)
}
  0x11   :  { %s268_s22 = smov 64   ;;  %s269_s23 = smov 4  }
  0x12   :  { %22 = dma.hbm_to_vmem [thread:$0]  %s335_s0, 128, %s17_s13, [#allocation3], %s268_s22, %s268_s22, %s269_s23  }
  0x13   :  { %s270_s26 = smov [#allocation5]   ;;  %s217_s30 = scalar_lea.hbm %s336_s1, 256 }
  0x14   :  { %s28_s27 = sshll.u32 %s270_s26, 4  ;;  %p218_p8 = scmp.ne.s32.totalorder %s336_s1, %s217_s30  ;;  %s29_s27 = int_to_ptr.vmem [resolvable:$true] %s28_s27 }
  0x15   :  { %p221_p9 = scmp.lt.u32.totalorder %s217_s30, %s336_s1 }
  0x17   :  { %p223_p10 = pnand %p221_p9, %p218_p8 }
  0x19   :  { %226 = shalt.err (!%p223_p10)
}
  0x1a   :  { %s227_s8 = scalar_lea.vmem %s29_s27, 256  ;;  %p232_p12 = scmp.lt.s32.totalorder %s29_s27, %s29_s27 }
  0x1b   :  { %p228_p11 = scmp.ne.s32.totalorder %s29_s27, %s227_s8  ;;  %p233_p13 = scmp.lt.s32.totalorder %s227_s8, %s227_s8 }
  0x1d   :  { %p234_p0 = por %p233_p13, %p232_p12 }
  0x1f   :  { %p235_p1 = pnand %p234_p0, %p228_p11 }
  0x21   :  { %238 = shalt.err (!%p235_p1)
}
  0x22   :  { %34 = dma.hbm_to_vmem [thread:$0]  %s336_s1, 256, %s29_s27, [#allocation6], %s268_s22, %s268_s22, %s269_s23  }
  0x23   :  { %261 = dma.done.wait [#allocation3], 128  }
  0x24   :  { %262 = vsyncadd [#allocation3], 4294967168 }
  0x25   :  { %263 = dma.done.wait [#allocation6], 256  }
  0x26   :  { %264 = vsyncadd [#allocation6], 4294967040  ;;  %v271_v0 = vmov 0.0   ;;  %vm272_vm0 = vmmov 0   ;;  %v184_v1 = vld [vmem:[#allocation5] sm:$0xff]   ;;  %v185_v2 = vld [vmem:[#allocation5 + $0x8] sm:$0xff]  }
  0x27   :  { %167 = vmatprep.subr.bf16.mxu0 %v271_v0  ;;  %171 = vmatprep.mubr.msk.bf16.mxu0 %vm272_vm0, %v271_v0  ;;  %v186_v3 = vld [vmem:[#allocation2] sm:$0xff]   ;;  %vm74_vm1 = vcmask 261120   ;;  %s273_s1 = smov [#allocation7]  }
  0x28   :  { %168 = vmatpush3.bf16.msra.mxu0 %v184_v1  ;;  %v159_v4 = vld [vmem:[%s337_s2] ss:$0 sm:$0xff]  ;;  %s146_s2 = sshll.u32 %s273_s1, 4  ;;  %s147_s2 = int_to_ptr.vmem [resolvable:$true] %s146_s2 }
  0x29   :  { %169 = vmatprep.subr.bf16.mxu0 %v271_v0  ;;  %s239_s12 = scalar_lea.vmem %s147_s2, 256  ;;  %p244_p3 = scmp.lt.s32.totalorder %s147_s2, %s147_s2 }
  0x2a   :  { %p240_p2 = scmp.ne.s32.totalorder %s147_s2, %s239_s12  ;;  %p245_p4 = scmp.lt.s32.totalorder %s239_s12, %s239_s12 }
  0x2c   :  { %170 = vmatpush3.bf16.msra.mxu0 %v185_v2  ;;  %p246_p5 = por %p245_p4, %p244_p3 }
  0x2e   :  { %p247_p6 = pnand %p246_p5, %p240_p2 }
  0x2f   :  { %172 = vmatmul.mubr.msk.bf16.vlgmr.msra.gmra.mrb[0].mxu0 %vm74_vm1, %v186_v3 }
 0x102   :  { %v112_v5 = vpop.f32.mrb[0].mxu0 }
 0x103   :  { %v113_v6 = vadd.f32 %v159_v4, %v112_v5  ;;  %v173_v7 = vpop.f32.mrb[1].mxu0 }
 0x104   :  { %v115_v8 = vpop.f32.mrb[2].mxu0 }
 0x105   :  { %119 = vmax.xlane.f32.xlu0 %v113_v6  ;;  %v174_v9 = vpop.f32.mrb[3].mxu0  ;;  %v116_v10 = vadd.f32 %v159_v4, %v115_v8 }
 0x109   :  { %121 = vmax.xlane.f32.xlu0 %v116_v10 }
 0x192   :  { %v120_v11 = vpop.xlane.xlu0 %119 }
 0x193   :  { %v123_v12 = vsub.f32 %v113_v6, %v120_v11 }
 0x195   :  { %v125_v13 = vmul.f32 1.442695, %v123_v12 }
 0x196   :  { %v122_v14 = vpop.xlane.xlu0 %121 }
 0x197   :  { %v124_v15 = vsub.f32 %v116_v10, %v122_v14  ;;  %187 = vpow2.f32 %v125_v13 }
 0x199   :  { %v127_v16 = vmul.f32 1.442695, %v124_v15 }
 0x19b   :  { %189 = vpow2.f32 %v127_v16 }
 0x1a1   :  { %v188_v17 = vpop.eup %187 }
 0x1a2   :  { %129 = vadd.xlane.f32.xlu1 %v188_v17 }
 0x1a5   :  { %v190_v18 = vpop.eup %189 }
 0x1a6   :  { %131 = vadd.xlane.f32.xlu1 %v190_v18 }
 0x22f   :  { %v130_v19 = vpop.xlane.xlu1 %129 }
 0x230   :  { %191 = vlog2.f32 %v130_v19 }
 0x233   :  { %v132_v20 = vpop.xlane.xlu1 %131 }
 0x234   :  { %193 = vlog2.f32 %v132_v20 }
 0x23a   :  { %v192_v21 = vpop.eup %191 }
 0x23b   :  { %v134_v22 = vmul.f32 0.6931472, %v192_v21 }
 0x23d   :  { %v137_v23 = vsub.f32 %v123_v12, %v134_v22 }
 0x23e   :  { %v194_v24 = vpop.eup %193 }
 0x23f   :  { %139 = vst [vmem:[#allocation7] sm:$0xff] %v137_v23  ;;  %v136_v25 = vmul.f32 0.6931472, %v194_v24 }
 0x241   :  { %v138_v26 = vsub.f32 %v124_v15, %v136_v25 }
 0x243   :  { %140 = vst [vmem:[#allocation7 + $0x8] sm:$0xff] %v138_v26 }
 0x244   :  { %250 = shalt.err (!%p247_p6)
}
 0x245   :  { %s251_s15 = scalar_lea.hbm %s338_s3, 256 }
 0x246   :  { %p252_p7 = scmp.ne.s32.totalorder %s338_s3, %s251_s15  ;;  %p255_p8 = scmp.lt.u32.totalorder %s251_s15, %s338_s3 }
 0x248   :  { %p257_p9 = pnand %p255_p8, %p252_p7 }
 0x24a   :  { %260 = shalt.err (!%p257_p9)
}
 0x24b   :  { %s274_s20 = smov 128   ;;  %s275_s21 = smov 8  }
 0x24c   :  { %152 = dma.vmem_to_hbm [thread:$0]  %s147_s2, 256, %s338_s3, [#allocation4], %s274_s20, %s274_s20, %s275_s21  }
 0x24d   :  { %265 = dma.done.wait [#allocation4], 256  }
 0x24e   :  { %266 = vsyncadd [#allocation4], 4294967040 }
 0x24f   :  { %156 = vsyncpa [#allocation3], 1 }
 0x250   :  { %157 = vsyncpa [#allocation6], 1 }
 0x251   :  { %158 = vsyncpa [#allocation4], 1 }

</bundles_post_ra>
